<compile_context>
chip_gen: v7x
topology: tpu7x:2x2x1
jax: 0.10.0
libtpu: 0.0.40
codegen_flags: <defaults>
</compile_context>

<pallas_src>
import functools

import jax
import jax.numpy as jnp
from jax.experimental import pallas as pl
from jax.experimental.pallas import tpu as pltpu


# --------------------------------------------------------------------------- #
# Kernel
# --------------------------------------------------------------------------- #
def _attribute_gnn_kernel(img_ref, edge_ref, wsrc_ref, bias_ref, wedge_ref,
                          pfwd_ref, pbwd_ref, sw_ref,
                          out_fwd_ref, out_bwd_ref,
                          agg_src_ref, bwd_acc_ref,
                          *, block_a, emb):
    step = pl.program_id(0)
    mm_dtype = wedge_ref.dtype  # MXU operand dtype (f32 here; bf16 optional)

    @pl.when(step == 0)
    def _init():
        # Grid-invariant half of Linear(2E->E): img @ W_src + b, computed once.
        # W_src / bias are pre-tiled to the block width in the wrapper so the
        # result adds directly onto the per-step [B, block_a*E] slab.
        agg_src_ref[...] = (
            jnp.dot(img_ref[...], wsrc_ref[...],
                    preferred_element_type=jnp.float32)
            + bias_ref[...])
        bwd_acc_ref[...] = jnp.zeros_like(bwd_acc_ref)

    # Edge half of the aggregation Linear for all block_a attributes at once:
    # [B, block_a*E] @ blockdiag(W_edge x block_a) -> [B, block_a*E]   (f32 acc)
    agg = (jnp.dot(edge_ref[...], wedge_ref[...],
                   preferred_element_type=jnp.float32)
           + agg_src_ref[...])                                  # [B, TA*E] f32

    # Forward attribute message: block-diagonal per-attribute projection.
    fwd = jnp.dot(agg.astype(mm_dtype), pfwd_ref[0],
                  preferred_element_type=jnp.float32)           # [B, TA*E] f32
    out_fwd_ref[...] = fwd.astype(out_fwd_ref.dtype)            # lane-dense store

    # Backward attribute message: project, relu, per-attribute weight, and
    # reduce over the block_a attributes of this block (static lane-slice sum).
    proj = jnp.dot(fwd.astype(mm_dtype), pbwd_ref[0],
                   preferred_element_type=jnp.float32)          # [B, TA*E] f32
    weighted = jnp.maximum(proj, 0.0) * sw_ref[...]             # [B, TA*E] f32
    bwd_local = weighted[:, 0:emb]
    for t in range(1, block_a):                                 # static unroll
        bwd_local = bwd_local + weighted[:, t * emb:(t + 1) * emb]

    bwd_acc_ref[...] += bwd_local                               # f32 accumulator

    @pl.when(step == pl.num_programs(0) - 1)
    def _finalize():
        out_bwd_ref[...] = bwd_acc_ref[...].astype(out_bwd_ref.dtype)


# --------------------------------------------------------------------------- #
# Wrapper
# --------------------------------------------------------------------------- #
def _grouped_block_diag(p, block):
    """[A, E, E] -> [A//block, block*E, block*E] (per-group block-diagonal)."""
    a, e, _ = p.shape
    g = a // block
    pg = p.reshape(g, block, e, e)
    eye = jnp.eye(block, dtype=p.dtype)
    out = jnp.einsum("tc,gtij->gticj", eye, pg)
    return out.reshape(g, block * e, block * e)


def attribute_gnn_pallas(image_features, edge_attributes, params, *,
                         add_backward=True, matmul_dtype=jnp.float32,
                         block_a=None):
    """image_features: [B, E] f32, edge_attributes: [B, A, E] f32."""
    B, A, E = edge_attributes.shape
    assert image_features.shape == (B, E)
    if block_a is None:
        block_a = A                      # whole attribute axis in one grid step
    assert A % block_a == 0
    n_steps = A // block_a
    if n_steps > 1:
        # blocked 2-D lane-dense views need a lane-aligned block width
        assert (block_a * E) % 128 == 0, "choose block_a so block_a*E % 128 == 0"

    # ---- parameter preprocessing (small, weight-only; activations untouched) ----
    wt = params["agg_weight_t"]                                   # [2E, E]
    w_src = wt[:E, :].astype(matmul_dtype)                        # [E, E]
    w_edge = wt[E:, :].astype(matmul_dtype)                       # [E, E]
    wsrc_tiled = jnp.tile(w_src, (1, block_a))                    # [E, TA*E]
    bias_tiled = jnp.tile(params["agg_bias"].reshape(1, E).astype(jnp.float32),
                          (1, block_a))                           # [1, TA*E]
    wedge_bd = jnp.kron(jnp.eye(block_a, dtype=matmul_dtype),
                        w_edge)                                   # [TA*E, TA*E]
    pfwd_bd = _grouped_block_diag(params["edge_proj_fwd"].astype(matmul_dtype),
                                  block_a)                        # [A/TA, TA*E, TA*E]
    pbwd_bd = _grouped_block_diag(params["edge_proj_bwd"].astype(matmul_dtype),
                                  block_a)
    sw = params["self_weighted"].reshape(A).astype(jnp.float32)
    sw_slab = jnp.repeat(sw, E).reshape(1, A * E)                 # sw[a] per E-chunk

    # ---- activations: free contiguous reshapes only (no transposes) ----
    img = image_features.astype(matmul_dtype)                     # [B, E]
    edge2d = edge_attributes.reshape(B, A * E).astype(matmul_dtype)

    kernel = functools.partial(_attribute_gnn_kernel, block_a=block_a, emb=E)

    out_fwd2d, out_bwd = pl.pallas_call(
        kernel,
        out_shape=(
            jax.ShapeDtypeStruct((B, A * E), jnp.float32),
            jax.ShapeDtypeStruct((B, E), jnp.float32),
        ),
        grid_spec=pltpu.PrefetchScalarGridSpec(
            num_scalar_prefetch=0,
            grid=(n_steps,),
            in_specs=[
                pl.BlockSpec((B, E), lambda a: (0, 0)),                      # image
                pl.BlockSpec((B, block_a * E), lambda a: (0, a)),            # edge slab
                pl.BlockSpec((E, block_a * E), lambda a: (0, 0)),            # W_src tiled
                pl.BlockSpec((1, block_a * E), lambda a: (0, 0)),            # bias tiled
                pl.BlockSpec((block_a * E, block_a * E), lambda a: (0, 0)),  # W_edge bd
                pl.BlockSpec((1, block_a * E, block_a * E),
                             lambda a: (a, 0, 0)),                           # P_fwd bd
                pl.BlockSpec((1, block_a * E, block_a * E),
                             lambda a: (a, 0, 0)),                           # P_bwd bd
                pl.BlockSpec((1, block_a * E), lambda a: (0, a)),            # self weights
            ],
            out_specs=[
                pl.BlockSpec((B, block_a * E), lambda a: (0, a)),            # fwd slab
                pl.BlockSpec((B, E), lambda a: (0, 0)),                      # bwd (resident)
            ],
            scratch_shapes=[
                pltpu.VMEM((B, block_a * E), jnp.float32),   # hoisted img@W_src + b
                pltpu.VMEM((B, E), jnp.float32),             # f32 backward accumulator
            ],
        ),
        compiler_params=pltpu.CompilerParams(
            dimension_semantics=("arbitrary",),  # scratch/accumulator carried over A
        ),
    )(img, edge2d, wsrc_tiled, bias_tiled, wedge_bd, pfwd_bd, pbwd_bd, sw_slab)

    attribute_representation = out_fwd2d.reshape(B, A, E)   # free reshape
    if add_backward:
        return attribute_representation, out_bwd
    return attribute_representation, None
    # TODO(synk): for very large batches add a leading "parallel" batch-tile grid
    # axis so v7x's two TensorCores split the work.


# --------------------------------------------------------------------------- #
# Pure-JAX reference (f32 everywhere so it also executes under interpret mode)
# --------------------------------------------------------------------------- #
def _reference(image_features, edge_attributes, params):
    B, A, E = edge_attributes.shape
    src = jnp.broadcast_to(image_features[:, None, :], (B, A, E))
    cat = jnp.concatenate([src, edge_attributes], axis=-1).astype(jnp.float32)
    agg = (jnp.dot(cat, params["agg_weight_t"].astype(jnp.float32),
                   preferred_element_type=jnp.float32)
           + params["agg_bias"])                                       # [B, A, E]
    fwd = jnp.einsum("bai,aij->baj", agg,
                     params["edge_proj_fwd"].astype(jnp.float32),
                     preferred_element_type=jnp.float32)               # [B, A, E]
    proj = jnp.einsum("bai,aij->baj", fwd,
                      params["edge_proj_bwd"].astype(jnp.float32),
                      preferred_element_type=jnp.float32)              # [B, A, E]
    bwd = jnp.sum(jnp.maximum(proj, 0.0)
                  * params["self_weighted"].reshape(1, A, 1), axis=1)  # [B, E]
    return fwd, bwd


def init_params(key, n_attr, emb):
    k1, k2, k3, k4, k5 = jax.random.split(key, 5)
    bound_proj = jnp.sqrt(6.0 / emb)      # kaiming-uniform-ish (synthetic init)
    bound_lin = jnp.sqrt(1.0 / (2 * emb))
    return {
        "edge_proj_fwd": jax.random.uniform(k1, (n_attr, emb, emb), jnp.float32,
                                            -bound_proj, bound_proj),
        "edge_proj_bwd": jax.random.uniform(k2, (n_attr, emb, emb), jnp.float32,
                                            -bound_proj, bound_proj),
        "agg_weight_t": jax.random.uniform(k3, (2 * emb, emb), jnp.float32,
                                           -bound_lin, bound_lin),
        "agg_bias": jax.random.uniform(k4, (emb,), jnp.float32,
                                       -bound_lin, bound_lin),
        # initialized to ones in the module; randomized here to exercise the path
        "self_weighted": jax.random.uniform(k5, (1, n_attr, 1), jnp.float32,
                                            0.5, 1.5),
    }


if __name__ == "__main__":
    B, A, E = 2, 4, 32   # batch, n_attributes (== len(node_types)), embedding_size
    key = jax.random.PRNGKey(0)
    k_img, k_edge, k_par = jax.random.split(key, 3)

    image_features = jax.random.normal(k_img, (B, E), jnp.float32)
    edge_attributes = jax.random.normal(k_edge, (B, A, E), jnp.float32)
    params = init_params(k_par, A, E)

    # f32 MXU operands vs. pure f32 reference (safe on TPU and interpret mode;
    # the bf16-operand production path is selectable via matmul_dtype=jnp.bfloat16
    # on real hardware but is not exercised here).
    fwd, bwd = attribute_gnn_pallas(image_features, edge_attributes, params,
                                    add_backward=True,
                                    matmul_dtype=jnp.float32)
    jax.block_until_ready((fwd, bwd))
    fwd_ref, bwd_ref = _reference(image_features, edge_attributes, params)
    assert fwd.shape == (B, A, E) and bwd.shape == (B, E)
    assert jnp.allclose(fwd, fwd_ref, rtol=1e-3, atol=1e-3)
    assert jnp.allclose(bwd, bwd_ref, rtol=1e-3, atol=1e-3)

    # add_backward=False path
    fwd_only, none_out = attribute_gnn_pallas(image_features, edge_attributes,
                                              params, add_backward=False,
                                              matmul_dtype=jnp.float32)
    jax.block_until_ready(fwd_only)
    assert none_out is None
    assert jnp.allclose(fwd_only, fwd_ref, rtol=1e-3, atol=1e-3)

    print("KERNEL_OK")
</pallas_src>

<mosaic_0001>
module attributes {stable_mosaic.version = 11 : i64} {
  func.func @_attribute_gnn_kernel(%arg0: i32, %arg1: memref<2x32xf32, #tpu.memory_space<vmem>>, %arg2: memref<2x128xf32, #tpu.memory_space<vmem>>, %arg3: memref<32x128xf32, #tpu.memory_space<vmem>>, %arg4: memref<1x128xf32, #tpu.memory_space<vmem>>, %arg5: memref<128x128xf32, #tpu.memory_space<vmem>>, %arg6: memref<1x128x128xf32, #tpu.memory_space<vmem>>, %arg7: memref<1x128x128xf32, #tpu.memory_space<vmem>>, %arg8: memref<1x128xf32, #tpu.memory_space<vmem>>, %arg9: memref<2x128xf32, #tpu.memory_space<vmem>>, %arg10: memref<2x32xf32, #tpu.memory_space<vmem>>, %arg11: memref<2x128xf32, #tpu.memory_space<vmem>>, %arg12: memref<2x32xf32, #tpu.memory_space<vmem>>) attributes {dimension_semantics = [#tpu.dimension_semantics<arbitrary>], iteration_bounds = array<i64: 1>, scalar_prefetch = 0 : i64, scratch_operands = 2 : i64, tpu.core_type = #tpu.core_type<tc>, window_params = [{pipeline_mode = #tpu.pipeline_mode<synchronous>, transform_indices = @transform_0, window_bounds = array<i64: 2, 32>}, {transform_indices = @transform_1, window_bounds = array<i64: 2, 128>}, {pipeline_mode = #tpu.pipeline_mode<synchronous>, transform_indices = @transform_2, window_bounds = array<i64: 32, 128>}, {pipeline_mode = #tpu.pipeline_mode<synchronous>, transform_indices = @transform_3, window_bounds = array<i64: 1, 128>}, {pipeline_mode = #tpu.pipeline_mode<synchronous>, transform_indices = @transform_4, window_bounds = array<i64: 128, 128>}, {transform_indices = @transform_5, window_bounds = array<i64: 1, 128, 128>}, {transform_indices = @transform_6, window_bounds = array<i64: 1, 128, 128>}, {transform_indices = @transform_7, window_bounds = array<i64: 1, 128>}, {transform_indices = @transform_8, window_bounds = array<i64: 2, 128>}, {pipeline_mode = #tpu.pipeline_mode<synchronous>, transform_indices = @transform_9, window_bounds = array<i64: 2, 32>}]} {
    %c0_i32 = arith.constant 0 : i32
    %0 = arith.cmpi eq, %arg0, %c0_i32 : i32
    %1 = arith.extui %0 : i1 to i32
    %c0_i32_0 = arith.constant 0 : i32
    %2 = arith.cmpi ne, %1, %c0_i32_0 : i32
    scf.if %2 {
      %c0_25 = arith.constant 0 : index
      %c0_26 = arith.constant 0 : index
      %33 = vector.load %arg1[%c0_25, %c0_26] : memref<2x32xf32, #tpu.memory_space<vmem>>, vector<2x32xf32>
      %c0_27 = arith.constant 0 : index
      %c0_28 = arith.constant 0 : index
      %34 = vector.load %arg3[%c0_27, %c0_28] : memref<32x128xf32, #tpu.memory_space<vmem>>, vector<32x128xf32>
      %cst_29 = arith.constant dense<0.000000e+00> : vector<2x128xf32>
      %35 = tpu.matmul %33, %34, %cst_29 {dimension_numbers = #tpu.dot_dimension_numbers<[1], [0], [0], [1], [0, 0, 1, 1], [], []>} : vector<2x32xf32>, vector<32x128xf32>, vector<2x128xf32> -> vector<2x128xf32>
      %c0_30 = arith.constant 0 : index
      %c0_31 = arith.constant 0 : index
      %36 = vector.load %arg4[%c0_30, %c0_31] : memref<1x128xf32, #tpu.memory_space<vmem>>, vector<1x128xf32>
      %37 = vector.broadcast %36 : vector<1x128xf32> to vector<2x128xf32>
      %38 = arith.addf %35, %37 : vector<2x128xf32>
      %c0_32 = arith.constant 0 : index
      %c0_33 = arith.constant 0 : index
      %39 = vector.load %arg11[%c0_32, %c0_33] : memref<2x128xf32, #tpu.memory_space<vmem>>, vector<2x128xf32>
      tpu.vector_store %arg11[%c0_32, %c0_33], %38 {strides = array<i32>} : memref<2x128xf32, #tpu.memory_space<vmem>>, vector<2x128xf32>,
      %cst_34 = arith.constant 0.000000e+00 : f32
      %40 = vector.broadcast %cst_34 : f32 to vector<2x32xf32>
      %c0_35 = arith.constant 0 : index
      %c0_36 = arith.constant 0 : index
      %41 = vector.load %arg12[%c0_35, %c0_36] : memref<2x32xf32, #tpu.memory_space<vmem>>, vector<2x32xf32>
      tpu.vector_store %arg12[%c0_35, %c0_36], %40 {strides = array<i32>} : memref<2x32xf32, #tpu.memory_space<vmem>>, vector<2x32xf32>,
    } else {
    }
    %c0 = arith.constant 0 : index
    %c0_1 = arith.constant 0 : index
    %3 = vector.load %arg2[%c0, %c0_1] : memref<2x128xf32, #tpu.memory_space<vmem>>, vector<2x128xf32>
    %c0_2 = arith.constant 0 : index
    %c0_3 = arith.constant 0 : index
    %4 = vector.load %arg5[%c0_2, %c0_3] : memref<128x128xf32, #tpu.memory_space<vmem>>, vector<128x128xf32>
    %cst = arith.constant dense<0.000000e+00> : vector<2x128xf32>
    %5 = tpu.matmul %3, %4, %cst {dimension_numbers = #tpu.dot_dimension_numbers<[1], [0], [0], [1], [0, 0, 1, 1], [], []>} : vector<2x128xf32>, vector<128x128xf32>, vector<2x128xf32> -> vector<2x128xf32>
    %c0_4 = arith.constant 0 : index
    %c0_5 = arith.constant 0 : index
    %6 = vector.load %arg11[%c0_4, %c0_5] : memref<2x128xf32, #tpu.memory_space<vmem>>, vector<2x128xf32>
    %7 = arith.addf %5, %6 : vector<2x128xf32>
    %c0_6 = arith.constant 0 : index
    %c0_7 = arith.constant 0 : index
    %c0_8 = arith.constant 0 : index
    %8 = vector.load %arg6[%c0_6, %c0_7, %c0_8] : memref<1x128x128xf32, #tpu.memory_space<vmem>>, vector<1x128x128xf32>
    %9 = vector.shape_cast %8 : vector<1x128x128xf32> to vector<128x128xf32>
    %cst_9 = arith.constant dense<0.000000e+00> : vector<2x128xf32>
    %10 = tpu.matmul %7, %9, %cst_9 {dimension_numbers = #tpu.dot_dimension_numbers<[1], [0], [0], [1], [0, 0, 1, 1], [], []>} : vector<2x128xf32>, vector<128x128xf32>, vector<2x128xf32> -> vector<2x128xf32>
    %c0_10 = arith.constant 0 : index
    %c0_11 = arith.constant 0 : index
    %11 = vector.load %arg9[%c0_10, %c0_11] : memref<2x128xf32, #tpu.memory_space<vmem>>, vector<2x128xf32>
    tpu.vector_store %arg9[%c0_10, %c0_11], %10 {strides = array<i32>} : memref<2x128xf32, #tpu.memory_space<vmem>>, vector<2x128xf32>,
    %c0_12 = arith.constant 0 : index
    %c0_13 = arith.constant 0 : index
    %c0_14 = arith.constant 0 : index
    %12 = vector.load %arg7[%c0_12, %c0_13, %c0_14] : memref<1x128x128xf32, #tpu.memory_space<vmem>>, vector<1x128x128xf32>
    %13 = vector.shape_cast %12 : vector<1x128x128xf32> to vector<128x128xf32>
    %cst_15 = arith.constant dense<0.000000e+00> : vector<2x128xf32>
    %14 = tpu.matmul %10, %13, %cst_15 {dimension_numbers = #tpu.dot_dimension_numbers<[1], [0], [0], [1], [0, 0, 1, 1], [], []>} : vector<2x128xf32>, vector<128x128xf32>, vector<2x128xf32> -> vector<2x128xf32>
    %cst_16 = arith.constant 0.000000e+00 : f32
    %15 = vector.broadcast %cst_16 : f32 to vector<2x128xf32>
    %16 = arith.maximumf %14, %15 : vector<2x128xf32>
    %c0_17 = arith.constant 0 : index
    %c0_18 = arith.constant 0 : index
    %17 = vector.load %arg8[%c0_17, %c0_18] : memref<1x128xf32, #tpu.memory_space<vmem>>, vector<1x128xf32>
    %18 = vector.broadcast %17 : vector<1x128xf32> to vector<2x128xf32>
    %19 = arith.mulf %16, %18 : vector<2x128xf32>
    %20 = vector.extract_strided_slice %19 {offsets = [0, 0], sizes = [2, 32], strides = [1, 1]} : vector<2x128xf32> to vector<2x32xf32>
    %21 = vector.extract_strided_slice %19 {offsets = [0, 32], sizes = [2, 32], strides = [1, 1]} : vector<2x128xf32> to vector<2x32xf32>
    %22 = arith.addf %20, %21 : vector<2x32xf32>
    %23 = vector.extract_strided_slice %19 {offsets = [0, 64], sizes = [2, 32], strides = [1, 1]} : vector<2x128xf32> to vector<2x32xf32>
    %24 = arith.addf %22, %23 : vector<2x32xf32>
    %25 = vector.extract_strided_slice %19 {offsets = [0, 96], sizes = [2, 32], strides = [1, 1]} : vector<2x128xf32> to vector<2x32xf32>
    %26 = arith.addf %24, %25 : vector<2x32xf32>
    %c0_19 = arith.constant 0 : index
    %c0_20 = arith.constant 0 : index
    %27 = vector.load %arg12[%c0_19, %c0_20] : memref<2x32xf32, #tpu.memory_space<vmem>>, vector<2x32xf32>
    %28 = arith.addf %27, %26 : vector<2x32xf32>
    %c0_21 = arith.constant 0 : index
    %c0_22 = arith.constant 0 : index
    %29 = vector.load %arg12[%c0_21, %c0_22] : memref<2x32xf32, #tpu.memory_space<vmem>>, vector<2x32xf32>
    tpu.vector_store %arg12[%c0_21, %c0_22], %28 {strides = array<i32>} : memref<2x32xf32, #tpu.memory_space<vmem>>, vector<2x32xf32>,
    %c0_i32_23 = arith.constant 0 : i32
    %30 = arith.cmpi eq, %arg0, %c0_i32_23 : i32
    %31 = arith.extui %30 : i1 to i32
    %c0_i32_24 = arith.constant 0 : i32
    %32 = arith.cmpi ne, %31, %c0_i32_24 : i32
    scf.if %32 {
      %c0_25 = arith.constant 0 : index
      %c0_26 = arith.constant 0 : index
      %33 = vector.load %arg12[%c0_25, %c0_26] : memref<2x32xf32, #tpu.memory_space<vmem>>, vector<2x32xf32>
      %c0_27 = arith.constant 0 : index
      %c0_28 = arith.constant 0 : index
      %34 = vector.load %arg10[%c0_27, %c0_28] : memref<2x32xf32, #tpu.memory_space<vmem>>, vector<2x32xf32>
      tpu.vector_store %arg10[%c0_27, %c0_28], %33 {strides = array<i32>} : memref<2x32xf32, #tpu.memory_space<vmem>>, vector<2x32xf32>,
    } else {
    }
    return
  }
  func.func @transform_0(%arg0: i32) -> (i32, i32) {
    %c0_i32 = arith.constant 0 : i32
    %c0_i32_0 = arith.constant 0 : i32
    %c0_i32_1 = arith.constant 0 : i32
    return %c0_i32, %c0_i32_0 : i32, i32
  }
  func.func @transform_1(%arg0: i32) -> (i32, i32) {
    %c0_i32 = arith.constant 0 : i32
    %c0_i32_0 = arith.constant 0 : i32
    return %c0_i32, %arg0 : i32, i32
  }
  func.func @transform_2(%arg0: i32) -> (i32, i32) {
    %c0_i32 = arith.constant 0 : i32
    %c0_i32_0 = arith.constant 0 : i32
    %c0_i32_1 = arith.constant 0 : i32
    return %c0_i32, %c0_i32_0 : i32, i32
  }
  func.func @transform_3(%arg0: i32) -> (i32, i32) {
    %c0_i32 = arith.constant 0 : i32
    %c0_i32_0 = arith.constant 0 : i32
    %c0_i32_1 = arith.constant 0 : i32
    return %c0_i32, %c0_i32_0 : i32, i32
  }
  func.func @transform_4(%arg0: i32) -> (i32, i32) {
    %c0_i32 = arith.constant 0 : i32
    %c0_i32_0 = arith.constant 0 : i32
    %c0_i32_1 = arith.constant 0 : i32
    return %c0_i32, %c0_i32_0 : i32, i32
  }
  func.func @transform_5(%arg0: i32) -> (i32, i32, i32) {
    %c0_i32 = arith.constant 0 : i32
    %c0_i32_0 = arith.constant 0 : i32
    %c0_i32_1 = arith.constant 0 : i32
    return %arg0, %c0_i32, %c0_i32_0 : i32, i32, i32
  }
  func.func @transform_6(%arg0: i32) -> (i32, i32, i32) {
    %c0_i32 = arith.constant 0 : i32
    %c0_i32_0 = arith.constant 0 : i32
    %c0_i32_1 = arith.constant 0 : i32
    return %arg0, %c0_i32, %c0_i32_0 : i32, i32, i32
  }
  func.func @transform_7(%arg0: i32) -> (i32, i32) {
    %c0_i32 = arith.constant 0 : i32
    %c0_i32_0 = arith.constant 0 : i32
    return %c0_i32, %arg0 : i32, i32
  }
  func.func @transform_8(%arg0: i32) -> (i32, i32) {
    %c0_i32 = arith.constant 0 : i32
    %c0_i32_0 = arith.constant 0 : i32
    return %c0_i32, %arg0 : i32, i32
  }
  func.func @transform_9(%arg0: i32) -> (i32, i32) {
    %c0_i32 = arith.constant 0 : i32
    %c0_i32_0 = arith.constant 0 : i32
    %c0_i32_1 = arith.constant 0 : i32
    return %c0_i32, %c0_i32_0 : i32, i32
  }
}

</mosaic_0001>

<bundles_post_ra>
// kernel: tpu_custom_call.1
= control target key start
LH: loop header
LB: loop body
LE: loop exit
PB: predicated region body
PF: predicated region fallthrough
CT: control target
= control target key end

     0   :  { %15 = vsyncpa [#allocation5], 0  ;;  %s1155_s0 = inlined_call_operand.hbm [shape: f32[2,32], index: 0, kind: input, shape index: {}]   ;;  %s1156_s1 = inlined_call_operand.vmem [shape: f32[2,128], index: 1, kind: input, shape index: {}]   ;;  %s1157_s2 = inlined_call_operand.hbm [shape: f32[32,128], index: 2, kind: input, shape index: {}]   ;;  %s1158_s3 = inlined_call_operand.vmem [shape: f32[1,128], index: 3, kind: input, shape index: {}]   ;;  %s1159_s4 = inlined_call_operand.hbm [shape: f32[128,128], index: 4, kind: input, shape index: {}]   ;;  %s1160_s5 = inlined_call_operand.hbm [shape: f32[1,128,128], index: 5, kind: input, shape index: {}]   ;;  %s1161_s6 = inlined_call_operand.hbm [shape: f32[1,128,128], index: 6, kind: input, shape index: {}]   ;;  %s1162_s7 = inlined_call_operand.vmem [shape: f32[1,128], index: 7, kind: input, shape index: {}]   ;;  %s1163_s8 = inlined_call_operand.hbm [shape: f32[2,128], index: 8, kind: output, shape index: {0}]   ;;  %s1164_s9 = inlined_call_operand.hbm [shape: f32[2,32], index: 9, kind: output, shape index: {1}]  }
   0x1   :  { %16 = vsyncpa [#allocation8], 0 }
   0x2   :  { %17 = vsyncpa [#allocation11], 0 }
   0x3   :  { %18 = vsyncpa [#allocation6], 0 }
   0x4   :  { %19 = vsyncpa [#allocation15], 0  ;;  %s947_s30 = smov [#allocation7]   ;;  %s783_s13 = scalar_lea.hbm %s1157_s2, 512 }
   0x5   :  { %s37_s10 = sshll.u32 %s947_s30, 4  ;;  %p784_p0 = scmp.ne.s32.totalorder %s1157_s2, %s783_s13  ;;  %s38_s10 = int_to_ptr.vmem [resolvable:$true] %s37_s10 }
   0x6   :  { %p787_p1 = scmp.lt.u32.totalorder %s783_s13, %s1157_s2 }
   0x8   :  { %p789_p2 = pnand %p787_p1, %p784_p0 }
   0xa   :  { %792 = shalt.err (!%p789_p2)
}
   0xb   :  { %s793_s18 = scalar_lea.vmem %s38_s10, 512  ;;  %p798_p4 = scmp.lt.s32.totalorder %s38_s10, %s38_s10 }
   0xc   :  { %p794_p3 = scmp.ne.s32.totalorder %s38_s10, %s793_s18  ;;  %p799_p5 = scmp.lt.s32.totalorder %s793_s18, %s793_s18 }
   0xe   :  { %p800_p6 = por %p799_p5, %p798_p4 }
  0x10   :  { %p801_p7 = pnand %p800_p6, %p794_p3 }
  0x12   :  { %804 = shalt.err (!%p801_p7)
}
  0x13   :  { %s948_s19 = smov 128   ;;  %s949_s20 = smov 8  }
  0x14   :  { %43 = dma.hbm_to_vmem [thread:$0]  %s1157_s2, 512, %s38_s10, [#allocation8], %s948_s19, %s948_s19, %s949_s20  }
  0x15   :  { %s950_s23 = smov [#allocation10]   ;;  %s951_s25 = smov [#allocation4]  }
  0x16   :  { %s63_s24 = sshll.u32 %s950_s23, 4  ;;  %s26_s26 = sshll.u32 %s951_s25, 4  ;;  %s64_s24 = int_to_ptr.vmem [resolvable:$true] %s63_s24  ;;  %s27_s26 = int_to_ptr.vmem [resolvable:$true] %s26_s26 }
  0x17   :  { %s805_s29 = scalar_lea.hbm %s1160_s5, 2048 }
  0x18   :  { %p806_p8 = scmp.ne.s32.totalorder %s1160_s5, %s805_s29  ;;  %p809_p9 = scmp.lt.u32.totalorder %s805_s29, %s1160_s5 }
  0x1a   :  { %p811_p10 = pnand %p809_p9, %p806_p8 }
  0x1c   :  { %814 = shalt.err (!%p811_p10)
}
  0x1d   :  { %s815_s2 = scalar_lea.vmem %s64_s24, 2048  ;;  %p820_p12 = scmp.lt.s32.totalorder %s64_s24, %s64_s24 }
  0x1e   :  { %p816_p11 = scmp.ne.s32.totalorder %s64_s24, %s815_s2  ;;  %p821_p13 = scmp.lt.s32.totalorder %s815_s2, %s815_s2 }
  0x20   :  { %p822_p0 = por %p821_p13, %p820_p12 }
  0x22   :  { %p823_p1 = pnand %p822_p0, %p816_p11 }
  0x24   :  { %826 = shalt.err (!%p823_p1)
}
  0x25   :  { %69 = dma.hbm_to_vmem [thread:$0]  %s1160_s5, 2048, %s64_s24, [#allocation11], %s948_s19, %s948_s19, %s949_s20  }
  0x26   :  { %s827_s17 = scalar_lea.hbm %s1155_s0, 32 }
  0x27   :  { %p828_p2 = scmp.ne.s32.totalorder %s1155_s0, %s827_s17  ;;  %p831_p3 = scmp.lt.u32.totalorder %s827_s17, %s1155_s0 }
  0x29   :  { %p833_p4 = pnand %p831_p3, %p828_p2 }
  0x2b   :  { %836 = shalt.err (!%p833_p4)
}
  0x2c   :  { %s837_s25 = scalar_lea.vmem %s27_s26, 32  ;;  %p842_p6 = scmp.lt.s32.totalorder %s27_s26, %s27_s26 }
  0x2d   :  { %p838_p5 = scmp.ne.s32.totalorder %s27_s26, %s837_s25  ;;  %p843_p7 = scmp.lt.s32.totalorder %s837_s25, %s837_s25 }
  0x2f   :  { %p844_p8 = por %p843_p7, %p842_p6 }
  0x31   :  { %p845_p9 = pnand %p844_p8, %p838_p5 }
  0x33   :  { %848 = shalt.err (!%p845_p9)
}
  0x34   :  { %29 = dma.hbm_to_vmem [thread:$0]  %s1155_s0, 32, %s27_s26, [#allocation5]  }
  0x35   :  { %s952_s27 = smov [#allocation9]   ;;  %s953_s29 = smov [#allocation12]  }
  0x36   :  { %s51_s28 = sshll.u32 %s952_s27, 4  ;;  %s75_s30 = sshll.u32 %s953_s29, 4  ;;  %s52_s28 = int_to_ptr.vmem [resolvable:$true] %s51_s28  ;;  %s76_s30 = int_to_ptr.vmem [resolvable:$true] %s75_s30 }
  0x37   :  { %s849_s13 = scalar_lea.hbm %s1159_s4, 2048 }
  0x38   :  { %p850_p10 = scmp.ne.s32.totalorder %s1159_s4, %s849_s13  ;;  %p853_p11 = scmp.lt.u32.totalorder %s849_s13, %s1159_s4 }
  0x3a   :  { %p855_p12 = pnand %p853_p11, %p850_p10 }
  0x3c   :  { %858 = shalt.err (!%p855_p12)
}
  0x3d   :  { %s859_s0 = scalar_lea.vmem %s52_s28, 2048  ;;  %p864_p0 = scmp.lt.s32.totalorder %s52_s28, %s52_s28 }
  0x3e   :  { %p860_p13 = scmp.ne.s32.totalorder %s52_s28, %s859_s0  ;;  %p865_p1 = scmp.lt.s32.totalorder %s859_s0, %s859_s0 }
  0x40   :  { %p866_p2 = por %p865_p1, %p864_p0 }
  0x42   :  { %p867_p3 = pnand %p866_p2, %p860_p13 }
  0x44   :  { %870 = shalt.err (!%p867_p3)
}
  0x45   :  { %57 = dma.hbm_to_vmem [thread:$0]  %s1159_s4, 2048, %s52_s28, [#allocation8], %s948_s19, %s948_s19, %s949_s20  }
  0x46   :  { %s871_s21 = scalar_lea.hbm %s1161_s6, 2048 }
  0x47   :  { %p872_p4 = scmp.ne.s32.totalorder %s1161_s6, %s871_s21  ;;  %p875_p5 = scmp.lt.u32.totalorder %s871_s21, %s1161_s6 }
  0x49   :  { %p877_p6 = pnand %p875_p5, %p872_p4 }
  0x4b   :  { %880 = shalt.err (!%p877_p6)
}
  0x4c   :  { %s881_s24 = scalar_lea.vmem %s76_s30, 2048  ;;  %p886_p8 = scmp.lt.s32.totalorder %s76_s30, %s76_s30 }
  0x4d   :  { %p882_p7 = scmp.ne.s32.totalorder %s76_s30, %s881_s24  ;;  %p887_p9 = scmp.lt.s32.totalorder %s881_s24, %s881_s24 }
  0x4f   :  { %p888_p10 = por %p887_p9, %p886_p8 }
  0x51   :  { %p889_p11 = pnand %p888_p10, %p882_p7 }
  0x53   :  { %892 = shalt.err (!%p889_p11)
}
  0x54   :  { %81 = dma.hbm_to_vmem [thread:$0]  %s1161_s6, 2048, %s76_s30, [#allocation11], %s948_s19, %s948_s19, %s949_s20  }
  0x55   :  { %937 = dma.done.wait [#allocation5], 32  }
  0x56   :  { %938 = vsyncadd [#allocation5], 4294967264 }
  0x57   :  { %939 = dma.done.wait [#allocation8], 2560  }
  0x58   :  { %940 = vsyncadd [#allocation8], 4294964736 }
  0x59   :  { %941 = dma.done.wait [#allocation11], 4096  }
  0x5a   :  { %942 = vsyncadd [#allocation11], 4294963200  ;;  %v954_v0 = vmov 0.0|0.0   ;;  %vm955_vm0 = vmmov 0   ;;  %v956_v1 = vmov 0.0   ;;  %v193_v2 = vld [vmem:[#allocation9] sm:$0xff] }
  0x5b   :  { %696 = vmatprep.subr.bf16.mxu1 %v954_v0  ;;  %690 = vmatprep.subr.bf16.mxu0 %v954_v0  ;;  %v194_v3 = vld [vmem:[#allocation9 + $0x8] sm:$0xff]  ;;  %v195_v4 = vld [vmem:[#allocation9 + $0x10] sm:$0xff]  ;;  %v196_v6 = vld [vmem:[#allocation9 + $0x18] sm:$0xff]  ;;  %vm115_vm1 = vcmask 261120   ;;  %vm190_vm2 = vcmask 254976   ;;  %s957_s28 = smov [#allocation13]  }
  0x5c   :  { %582 = vmatprep.mubr.msk.f32.mxu0 %vm955_vm0, %v956_v1  ;;  %617 = vmatprep.mubr.msk.f32.mxu1 %vm955_vm0, %v956_v1  ;;  %v697_v5 = vpack.c.bf16 %v194_v3, %v193_v2  ;;  %v104_v7 = vld [vmem:[#allocation7] sm:$0xff]  ;;  %v700_v8 = vpack.c.bf16 %v196_v6, %v195_v4  ;;  %v105_v10 = vld [vmem:[#allocation7 + $0x8] sm:$0xff]  ;;  %v106_v13 = vld [vmem:[#allocation7 + $0x10] sm:$0xff]  ;;  %191 = vst.msk [vmem:[#allocation3] sm:$0x3] %vm190_vm2, %v956_v1  ;;  %s490_s29 = sshll.u32 %s957_s28, 4  ;;  %s491_s29 = int_to_ptr.vmem [resolvable:$true] %s490_s29 }
  0x5d   :  { %v197_v9 = vld [vmem:[#allocation9 + $0x20] sm:$0xff]  ;;  %v198_v11 = vld [vmem:[#allocation9 + $0x28] sm:$0xff]  ;;  %v691_v12 = vpack.c.bf16 %v105_v10, %v104_v7  ;;  %v107_v14 = vld [vmem:[#allocation7 + $0x18] sm:$0xff]  ;;  %s893_s11 = scalar_lea.vmem %s491_s29, 32  ;;  %p898_p13 = scmp.lt.s32.totalorder %s491_s29, %s491_s29 }
  0x5e   :  { %698 = vmatpush3.bf16.msra.mxu1 %v697_v5  ;;  %v694_v15 = vpack.c.bf16 %v107_v14, %v106_v13  ;;  %v703_v16 = vpack.c.bf16 %v198_v11, %v197_v9  ;;  %v280_v17 = vld [vmem:[#allocation10] sm:$0xff]  ;;  %v281_v18 = vld [vmem:[#allocation10 + $0x8] sm:$0xff]  ;;  %v199_v19 = vld [vmem:[#allocation9 + $0x30] sm:$0xff]  ;;  %p894_p12 = scmp.ne.s32.totalorder %s491_s29, %s893_s11  ;;  %p899_p0 = scmp.lt.s32.totalorder %s893_s11, %s893_s11 }
  0x5f   :  { %699 = vmatprep.subr.bf16.mxu1 %v954_v0  ;;  %692 = vmatpush3.bf16.msra.mxu0 %v691_v12  ;;  %v200_v20 = vld [vmem:[#allocation9 + $0x38] sm:$0xff]  ;;  %v721_v22 = vpack.c.bf16 %v281_v18, %v280_v17  ;;  %v282_v24 = vld [vmem:[#allocation10 + $0x10] sm:$0xff]  ;;  %v201_v26 = vld [vmem:[#allocation9 + $0x40] sm:$0xff] }
  0x60   :  { %693 = vmatprep.subr.bf16.mxu0 %v954_v0  ;;  %v103_v21 = vld [vmem:[#allocation4] sm:$0x3]  ;;  %v706_v23 = vpack.c.bf16 %v200_v20, %v199_v19  ;;  %v202_v27 = vld [vmem:[#allocation9 + $0x48] sm:$0xff]  ;;  %v284_v30 = vld [vmem:[#allocation10 + $0x20] sm:$0xff]  ;;  %p900_p1 = por %p899_p0, %p898_p13 }
  0x61   :  { %v283_v25 = vld [vmem:[#allocation10 + $0x18] sm:$0xff]  ;;  %v709_v29 = vpack.c.bf16 %v202_v27, %v201_v26  ;;  %v285_v31 = vld [vmem:[#allocation10 + $0x28] sm:$0xff]  ;;  %v203_v32 = vld [vmem:[#allocation9 + $0x50] sm:$0xff] }
  0x62   :  { %701 = vmatpush3.bf16.msra.mxu1 %v700_v8  ;;  %v724_v28 = vpack.c.bf16 %v283_v25, %v282_v24  ;;  %v204_v33 = vld [vmem:[#allocation9 + $0x58] sm:$0xff]  ;;  %v727_v34 = vpack.c.bf16 %v285_v31, %v284_v30  ;;  %v286_v36 = vld [vmem:[#allocation10 + $0x30] sm:$0xff]  ;;  %v205_v38 = vld [vmem:[#allocation9 + $0x60] sm:$0xff]  ;;  %p901_p2 = pnand %p900_p1, %p894_p12 }
  0x63   :  { %702 = vmatprep.subr.bf16.mxu1 %v954_v0  ;;  %695 = vmatpush3.bf16.msra.mxu0 %v694_v15  ;;  %v712_v35 = vpack.c.bf16 %v204_v33, %v203_v32  ;;  %v287_v37 = vld [vmem:[#allocation10 + $0x38] sm:$0xff]  ;;  %v206_v39 = vld [vmem:[#allocation9 + $0x68] sm:$0xff]  ;;  %v288_v42 = vld [vmem:[#allocation10 + $0x40] sm:$0xff] }
  0x64   :  { %720 = vmatprep.subr.bf16.mxu0 %v954_v0  ;;  %v730_v40 = vpack.c.bf16 %v287_v37, %v286_v36  ;;  %v715_v41 = vpack.c.bf16 %v206_v39, %v205_v38  ;;  %v289_v43 = vld [vmem:[#allocation10 + $0x48] sm:$0xff]  ;;  %v207_v44 = vld [vmem:[#allocation9 + $0x70] sm:$0xff]  ;;  %v208_v45 = vld [vmem:[#allocation9 + $0x78] sm:$0xff] }
  0x65   :  { %v733_v46 = vpack.c.bf16 %v289_v43, %v288_v42  ;;  %v718_v47 = vpack.c.bf16 %v208_v45, %v207_v44  ;;  %v192_v48 = vld [vmem:[%s1156_s1] sm:$0x3]  ;;  %v290_v49 = vld [vmem:[#allocation10 + $0x50] sm:$0xff]  ;;  %v292_v51 = vld [vmem:[#allocation10 + $0x60] sm:$0xff] }
  0x66   :  { %704 = vmatpush3.bf16.msra.mxu1 %v703_v16  ;;  %583 = vmatmul.mubr.msk.f32.vlgmr.msra.gmra.mrb[0].mxu0 %vm115_vm1, %v103_v21  ;;  %v291_v50 = vld [vmem:[#allocation10 + $0x58] sm:$0xff]  ;;  %v293_v53 = vld [vmem:[#allocation10 + $0x68] sm:$0xff]  ;;  %v294_v55 = vld [vmem:[#allocation10 + $0x70] sm:$0xff] }
  0x67   :  { %705 = vmatprep.subr.bf16.mxu1 %v954_v0  ;;  %722 = vmatpush3.bf16.msra.mxu0 %v721_v22  ;;  %v736_v52 = vpack.c.bf16 %v291_v50, %v290_v49  ;;  %v739_v54 = vpack.c.bf16 %v293_v53, %v292_v51  ;;  %v295_v56 = vld [vmem:[#allocation10 + $0x78] sm:$0xff]  ;;  %v367_v58 = vld [vmem:[#allocation12] sm:$0xff]  ;;  %v368_v59 = vld [vmem:[#allocation12 + $0x8] sm:$0xff] }
  0x68   :  { %652 = vmatprep.mubr.msk.f32.mxu0 %vm955_vm0, %v956_v1  ;;  %723 = vmatprep.subr.bf16.mxu0 %v954_v0  ;;  %v742_v57 = vpack.c.bf16 %v295_v56, %v294_v55  ;;  %v369_v60 = vld [vmem:[#allocation12 + $0x10] sm:$0xff]  ;;  %v745_v61 = vpack.c.bf16 %v368_v59, %v367_v58  ;;  %v370_v62 = vld [vmem:[#allocation12 + $0x18] sm:$0xff]  ;;  %v371_v2 = vld [vmem:[#allocation12 + $0x20] sm:$0xff] }
  0x69   :  { %v748_v63 = vpack.c.bf16 %v370_v62, %v369_v60  ;;  %v372_v3 = vld [vmem:[#allocation12 + $0x28] sm:$0xff]  ;;  %v373_v5 = vld [vmem:[#allocation12 + $0x30] sm:$0xff]  ;;  %v374_v6 = vld [vmem:[#allocation12 + $0x38] sm:$0xff] }
  0x6a   :  { %707 = vmatpush3.bf16.msra.mxu1 %v706_v23  ;;  %v751_v4 = vpack.c.bf16 %v372_v3, %v371_v2  ;;  %v754_v7 = vpack.c.bf16 %v374_v6, %v373_v5  ;;  %v375_v8 = vld [vmem:[#allocation12 + $0x40] sm:$0xff]  ;;  %v376_v9 = vld [vmem:[#allocation12 + $0x48] sm:$0xff]  ;;  %v377_v11 = vld [vmem:[#allocation12 + $0x50] sm:$0xff] }
  0x6b   :  { %708 = vmatprep.subr.bf16.mxu1 %v954_v0  ;;  %725 = vmatpush3.bf16.msra.mxu0 %v724_v28  ;;  %v757_v10 = vpack.c.bf16 %v376_v9, %v375_v8  ;;  %v378_v12 = vld [vmem:[#allocation12 + $0x58] sm:$0xff]  ;;  %v379_v14 = vld [vmem:[#allocation12 + $0x60] sm:$0xff]  ;;  %v380_v15 = vld [vmem:[#allocation12 + $0x68] sm:$0xff] }
  0x6c   :  { %726 = vmatprep.subr.bf16.mxu0 %v954_v0  ;;  %v760_v13 = vpack.c.bf16 %v378_v12, %v377_v11  ;;  %v763_v16 = vpack.c.bf16 %v380_v15, %v379_v14  ;;  %v381_v17 = vld [vmem:[#allocation12 + $0x70] sm:$0xff]  ;;  %v382_v18 = vld [vmem:[#allocation12 + $0x78] sm:$0xff] }
  0x6d   :  { %v766_v19 = vpack.c.bf16 %v382_v18, %v381_v17  ;;  %v515_v20 = vld [vmem:[%s1158_s3] ss:$0 sm:$0xff] }
  0x6e   :  { %710 = vmatpush3.bf16.msra.mxu1 %v709_v29  ;;  %v517_v30 = vld [vmem:[%s1162_s7] ss:$0 sm:$0xff] }
  0x6f   :  { %711 = vmatprep.subr.bf16.mxu1 %v954_v0  ;;  %728 = vmatpush3.bf16.msra.mxu0 %v727_v34 }
  0x70   :  { %729 = vmatprep.subr.bf16.mxu0 %v954_v0 }
  0x72   :  { %713 = vmatpush3.bf16.msra.mxu1 %v712_v35 }
  0x73   :  { %714 = vmatprep.subr.bf16.mxu1 %v954_v0  ;;  %731 = vmatpush3.bf16.msra.mxu0 %v730_v40 }
  0x74   :  { %732 = vmatprep.subr.bf16.mxu0 %v954_v0 }
  0x76   :  { %716 = vmatpush3.bf16.msra.mxu1 %v715_v41 }
  0x77   :  { %717 = vmatprep.subr.bf16.mxu1 %v954_v0  ;;  %734 = vmatpush3.bf16.msra.mxu0 %v733_v46 }
  0x78   :  { %735 = vmatprep.subr.bf16.mxu0 %v954_v0 }
  0x7a   :  { %719 = vmatpush3.bf16.msra.mxu1 %v718_v47 }
  0x7b   :  { %744 = vmatprep.subr.bf16.mxu1 %v954_v0  ;;  %737 = vmatpush3.bf16.msra.mxu0 %v736_v52 }
  0x7c   :  { %738 = vmatprep.subr.bf16.mxu0 %v954_v0 }
  0x7d   :  { %618 = vmatmul.mubr.f32.vlgmr.msra.gmra.mrb[0].mxu1 %v192_v48 }
  0x7e   :  { %687 = vmatprep.mubr.msk.f32.mxu1 %vm955_vm0, %v956_v1  ;;  %746 = vmatpush3.bf16.msra.mxu1 %v745_v61 }
  0x7f   :  { %740 = vmatpush3.bf16.msra.mxu0 %v739_v54  ;;  %747 = vmatprep.subr.bf16.mxu1 %v954_v0 }
  0x80   :  { %741 = vmatprep.subr.bf16.mxu0 %v954_v0 }
  0x82   :  { %749 = vmatpush3.bf16.msra.mxu1 %v748_v63 }
  0x83   :  { %743 = vmatpush3.bf16.msra.mxu0 %v742_v57  ;;  %750 = vmatprep.subr.bf16.mxu1 %v954_v0 }
  0x86   :  { %752 = vmatpush3.bf16.msra.mxu1 %v751_v4 }
  0x87   :  { %753 = vmatprep.subr.bf16.mxu1 %v954_v0 }
  0x8a   :  { %755 = vmatpush3.bf16.msra.mxu1 %v754_v7 }
  0x8b   :  { %756 = vmatprep.subr.bf16.mxu1 %v954_v0 }
  0x8e   :  { %758 = vmatpush3.bf16.msra.mxu1 %v757_v10 }
  0x8f   :  { %759 = vmatprep.subr.bf16.mxu1 %v954_v0 }
  0x92   :  { %761 = vmatpush3.bf16.msra.mxu1 %v760_v13 }
  0x93   :  { %762 = vmatprep.subr.bf16.mxu1 %v954_v0 }
  0x96   :  { %764 = vmatpush3.bf16.msra.mxu1 %v763_v16 }
  0x97   :  { %765 = vmatprep.subr.bf16.mxu1 %v954_v0 }
  0x9a   :  { %767 = vmatpush3.bf16.msra.mxu1 %v766_v19 }
 0x139   :  { %v185_v21 = vpop.f32.mrb[0].mxu0 }
 0x13a   :  { %v186_v22 = vadd.f32 %v515_v20, %v185_v21  ;;  %v584_v23 = vpop.f32.mrb[1].mxu0 }
 0x13c   :  { %189 = vst [vmem:[#allocation2] sm:$0x3] %v186_v22 }
 0x143   :  { %v209_v24 = vld [vmem:[#allocation2] sm:$0x3] }
 0x150   :  { %v276_v25 = vpop.f32.mrb[0].mxu1 }
 0x151   :  { %v277_v26 = vadd.f32 %v276_v25, %v209_v24  ;;  %v619_v27 = vpop.f32.mrb[1].mxu1 }
 0x153   :  { %653 = vmatmul.mubr.f32.vlgmr.msra.gmra.mrb[2].mxu0 %v277_v26 }
 0x226   :  { %v362_v28 = vpop.f32.mrb[2].mxu0 }
 0x227   :  { %366 = vst [vmem:[#allocation13] sm:$0x3] %v362_v28  ;;  %v654_v29 = vpop.f32.mrb[3].mxu0  ;;  %688 = vmatmul.mubr.f32.vlgmr.msra.gmra.mrb[2].mxu1 %v362_v28 }
 0x2fa   :  { %v449_v0 = vpop.f32.mrb[2].mxu1 }
 0x2fb   :  { %v453_v31 = vmax.f32 %v449_v0, 0.0  ;;  %v689_v32 = vpop.f32.mrb[3].mxu1 }
 0x2fc   :  { %904 = shalt.err (!%p901_p2)
}
 0x2fd   :  { %s905_s2 = scalar_lea.hbm %s1163_s8, 32 }
 0x2fe   :  { %p906_p3 = scmp.ne.s32.totalorder %s1163_s8, %s905_s2  ;;  %p909_p4 = scmp.lt.u32.totalorder %s905_s2, %s1163_s8 }
 0x300   :  { %p911_p5 = pnand %p909_p4, %p906_p3 }
 0x302   :  { %914 = shalt.err (!%p911_p5)
}
 0x303   :  { %493 = dma.vmem_to_hbm [thread:$0]  %s491_s29, 32, %s1163_s8, [#allocation6]   ;;  %v461_v1 = vmul.f32 %v517_v30, %v453_v31  ;;  %v475_v38 = vld [vmem:[#allocation3] sm:$0x3] }
 0x304   :  { %s958_s16 = smov 32   ;;  %s959_s17 = smov 96  }
 0x305   :  { %471 = vrot.lane.b32.xlu1 %v461_v1, %s958_s16  ;;  %463 = vrot.lane.b32.xlu0 %v461_v1, %s959_s17  ;;  %s960_s18 = smov 64   ;;  %s961_s21 = smov [#allocation14]  }
 0x306   :  { %s500_s22 = sshll.u32 %s961_s21, 4  ;;  %s501_s22 = int_to_ptr.vmem [resolvable:$true] %s500_s22 }
 0x307   :  { %s915_s8 = scalar_lea.vmem %s501_s22, 32  ;;  %p920_p7 = scmp.lt.s32.totalorder %s501_s22, %s501_s22 }
 0x308   :  { %p916_p6 = scmp.ne.s32.totalorder %s501_s22, %s915_s8  ;;  %p921_p8 = scmp.lt.s32.totalorder %s915_s8, %s915_s8 }
 0x309   :  { %467 = vrot.lane.b32.xlu0 %v461_v1, %s960_s18 }
 0x30a   :  { %p922_p9 = por %p921_p8, %p920_p7 }
 0x30c   :  { %p923_p10 = pnand %p922_p9, %p916_p6 }
 0x377   :  { %v464_v33 = vpop.permute.xlu0 %463  ;;  %v472_v37 = vpop.permute.xlu1 %471 }
 0x378   :  { %v466_v34 = vadd.f32 %v464_v33, %v461_v1 }
 0x37b   :  { %v468_v35 = vpop.permute.xlu0 %467 }
 0x37c   :  { %v470_v36 = vadd.f32 %v468_v35, %v466_v34 }
 0x37e   :  { %v474_v39 = vadd.f32 %v472_v37, %v470_v36 }
 0x380   :  { %v476_v40 = vadd.f32 %v475_v38, %v474_v39 }
 0x382   :  { %478 = vst.msk [vmem:[#allocation3] sm:$0x3] %vm190_vm2, %v476_v40 }
 0x389   :  { %v482_v41 = vld [vmem:[#allocation3] sm:$0x3] }
 0x38a   :  { %483 = vst.msk [vmem:[#allocation14] sm:$0x3] %vm190_vm2, %v482_v41 }
 0x38b   :  { %926 = shalt.err (!%p923_p10)
}
 0x38c   :  { %s927_s5 = scalar_lea.hbm %s1164_s9, 32 }
 0x38d   :  { %p928_p11 = scmp.ne.s32.totalorder %s1164_s9, %s927_s5  ;;  %p931_p12 = scmp.lt.u32.totalorder %s927_s5, %s1164_s9 }
 0x38f   :  { %p933_p13 = pnand %p931_p12, %p928_p11 }
 0x391   :  { %936 = shalt.err (!%p933_p13)
}
 0x392   :  { %503 = dma.vmem_to_hbm [thread:$0]  %s501_s22, 32, %s1164_s9, [#allocation15]  }
 0x393   :  { %943 = dma.done.wait [#allocation6], 32  }
 0x394   :  { %944 = vsyncadd [#allocation6], 4294967264 }
 0x395   :  { %945 = dma.done.wait [#allocation15], 32  }
 0x396   :  { %946 = vsyncadd [#allocation15], 4294967264 }
 0x397   :  { %510 = vsyncpa [#allocation5], 1 }
 0x398   :  { %511 = vsyncpa [#allocation8], 1 }
 0x399   :  { %512 = vsyncpa [#allocation11], 1 }
 0x39a   :  { %513 = vsyncpa [#allocation6], 1 }
 0x39b   :  { %514 = vsyncpa [#allocation15], 1 }

</bundles_post_ra>
